<compile_context>
chip_gen: v7x
topology: tpu7x:2x2x1
jax: 0.10.0
libtpu: 0.0.40
codegen_flags: <defaults>
</compile_context>

<pallas_src>
import jax
import jax.numpy as jnp
from jax.experimental import pallas as pl
from jax.experimental.pallas import tpu as pltpu

EPSILON = 1e-8
_LANE = 128
_MAX_BLOCK_BYTES = 8 * 1024 * 1024     # ~HBM-roofline plateau per measured data


def _pixelnorm_kernel(x_ref, o_ref):
    # Block (batch dim squeezed by BlockSpec): (C, S_TILE, 128).
    c_dim = x_ref.shape[0]
    inv_c = jnp.float32(1.0 / c_dim)
    pix_shape = x_ref.shape[1:]                       # (S_TILE, 128)

    # Sum of squares over channels, streamed one channel slice at a time so the
    # only block-sized f32 temporary is the (S_TILE, 128) accumulator.
    def acc_body(c, ss):
        xc = x_ref[c].astype(jnp.float32)
        return ss + xc * xc

    ss = jax.lax.fori_loop(0, c_dim, acc_body,
                           jnp.zeros(pix_shape, jnp.float32))

    # mean -> sum * (1/C) folded into the rsqrt argument; one EUP rsqrt/pixel.
    inv = jax.lax.rsqrt(ss * inv_c + jnp.float32(EPSILON))

    # Normalize channel-by-channel: broadcast-free multiply on (S_TILE, 128)
    # slices, unmasked lane-dense stores, no full-block f32 temporary.
    def write_body(c, carry):
        xc = x_ref[c].astype(jnp.float32)
        o_ref[c] = (xc * inv).astype(o_ref.dtype)
        return carry

    jax.lax.fori_loop(0, c_dim, write_body, 0)


def _vmem_capacity_bytes():
    try:
        return int(pltpu.get_tpu_info().vmem_capacity_bytes)
    except Exception:
        return 128 * 1024 * 1024


def _pipeline_budget_bytes(capacity):
    # v7x has 64 MiB physical VMEM per TensorCore; v5e/v6e have 128 MiB.
    if capacity <= 64 * 1024 * 1024:
        return 28 * 1024 * 1024
    return 48 * 1024 * 1024


def _choose_sublane_tile(n, s_total, c, itemsize, pack, budget):
    """Spatial sublane tile (rows of 128 lanes) per grid step."""
    # Per sublane row: 2 double-buffered input + 2 double-buffered output
    # pipeline buffers plus a few f32 rows of in-kernel temporaries
    # (accumulator, inv, one streamed channel slice).
    per_row = 4 * c * _LANE * itemsize + 6 * _LANE * 4
    tile = budget // per_row
    # Cap individual blocks; beyond ~8 MiB DMA efficiency has plateaued and the
    # extra VMEM is better left as headroom / grid granularity.
    tile = min(tile, _MAX_BLOCK_BYTES // max(1, c * _LANE * itemsize))
    tile = max(pack, (tile // pack) * pack)
    if tile >= s_total:
        tile = s_total        # full-array-dim exemption: one spatial tile
    # Keep >= 2 parallel grid steps when possible so both v7x TensorCores run
    # even for N == 1 calls (one extra grid step costs ~0.35 us elsewhere).
    if n * pl.cdiv(s_total, tile) < 2 and s_total > pack:
        tile = pl.cdiv(pl.cdiv(s_total, 2), pack) * pack
    return tile


def _pixel_norm_xla(x):
    # Tiny ProGAN stages (4x4, 8x8) and ragged spatial maps: padding HW up to a
    # lane multiple would cost two extra full-tensor HBM passes and the work is
    # latency-dominated, so plain XLA fusion is the right tool here.
    ms = jnp.mean(x.astype(jnp.float32) ** 2, axis=1, keepdims=True)
    y = x.astype(jnp.float32) * jax.lax.rsqrt(ms + jnp.float32(EPSILON))
    return y.astype(x.dtype)


def pixel_norm(x):
    """PixelNorm: x / sqrt(mean(x**2, dim=1, keepdim=True) + 1e-8), NCHW."""
    N, C, H, W = x.shape
    HW = H * W
    if HW % _LANE != 0:
        return _pixel_norm_xla(x)

    itemsize = jnp.dtype(x.dtype).itemsize
    pack = max(8, 32 // itemsize)            # sublane packing: 8/16/32 rows
    S = HW // _LANE                          # sublane rows covering H*W

    capacity = _vmem_capacity_bytes()
    budget = _pipeline_budget_bytes(capacity)
    s_tile = _choose_sublane_tile(N, S, C, itemsize, pack, budget)

    block_bytes = C * s_tile * _LANE * itemsize
    vmem_need = 4 * block_bytes + 6 * s_tile * _LANE * 4 + (2 << 20)
    vmem_limit = int(min(max(vmem_need, budget), int(capacity * 0.9)))

    x4 = x.reshape(N, C, S, _LANE)           # lane-dense; no pad/slice passes
    block = (pl.Squeezed(), C, s_tile, _LANE)
    index_map = lambda i, j: (i, 0, j, 0)
    grid = (N, pl.cdiv(S, s_tile))

    out4 = pl.pallas_call(
        _pixelnorm_kernel,
        out_shape=jax.ShapeDtypeStruct((N, C, S, _LANE), x.dtype),
        grid_spec=pltpu.PrefetchScalarGridSpec(
            num_scalar_prefetch=0,
            grid=grid,
            in_specs=[pl.BlockSpec(block, index_map)],
            out_specs=pl.BlockSpec(block, index_map),
        ),
        compiler_params=pltpu.CompilerParams(
            dimension_semantics=("parallel", "parallel"),
            vmem_limit_bytes=vmem_limit,
        ),
        cost_estimate=pl.CostEstimate(
            flops=3 * N * C * HW + 3 * N * HW,
            transcendentals=N * HW,
            bytes_accessed=2 * N * C * HW * itemsize,
        ),
    )(x4)

    return out4.reshape(N, C, H, W)


def pixel_norm_ref(x):
    # Pure-JAX reference for correctness check (matches PyTorch semantics).
    ms = jnp.mean(x.astype(jnp.float32) ** 2, axis=1, keepdims=True)
    return (x.astype(jnp.float32) / jnp.sqrt(ms + EPSILON)).astype(x.dtype)


if __name__ == "__main__":
    key = jax.random.PRNGKey(0)

    # Small NCHW input consistent with ProGAN feature maps (HW = 256 = 2*128).
    x = jax.random.normal(key, (2, 4, 16, 16), dtype=jnp.float32)
    ref = pixel_norm_ref(x)
    out = jax.block_until_ready(pixel_norm(x))
    assert out.shape == x.shape
    assert out.dtype == x.dtype
    assert jnp.allclose(out, ref, atol=1e-5, rtol=1e-5)

    # Also exercise the multi-tile / N==1 re-split path (grid = (1, 2)).
    x2 = jax.random.normal(jax.random.PRNGKey(1), (1, 16, 64, 64),
                           dtype=jnp.float32)
    out2 = jax.block_until_ready(pixel_norm(x2))
    assert jnp.allclose(out2, pixel_norm_ref(x2), atol=1e-5, rtol=1e-5)

    print("KERNEL_OK")
</pallas_src>

<mosaic_0001>
module attributes {stable_mosaic.version = 11 : i64} {
  func.func @_pixelnorm_kernel(%arg0: i32, %arg1: i32, %arg2: memref<1x4x2x128xf32, #tpu.memory_space<vmem>>, %arg3: memref<1x4x2x128xf32, #tpu.memory_space<vmem>>) attributes {dimension_semantics = [#tpu.dimension_semantics<parallel>, #tpu.dimension_semantics<parallel>], iteration_bounds = array<i64: 2, 1>, scalar_prefetch = 0 : i64, scratch_operands = 0 : i64, tpu.core_type = #tpu.core_type<tc>, window_params = [{transform_indices = @transform_0, window_bounds = array<i64: 1, 4, 2, 128>}, {transform_indices = @transform_1, window_bounds = array<i64: 1, 4, 2, 128>}]} {
    %cst = arith.constant 0.000000e+00 : f32
    %0 = vector.broadcast %cst : f32 to vector<2x128xf32>
    %c0_i32 = arith.constant 0 : i32
    %c4_i32 = arith.constant 4 : i32
    %1 = arith.addi %c0_i32, %c4_i32 : i32
    %c1_i32 = arith.constant 1 : i32
    %2 = scf.for %arg4 = %c0_i32 to %1 step %c1_i32 iter_args(%arg5 = %0) -> (vector<2x128xf32>)  : i32 {
      %c0 = arith.constant 0 : index
      %9 = arith.index_cast %arg4 : i32 to index
      %c0_7 = arith.constant 0 : index
      %c0_8 = arith.constant 0 : index
      %10 = vector.load %arg2[%c0, %9, %c0_7, %c0_8] : memref<1x4x2x128xf32, #tpu.memory_space<vmem>>, vector<1x1x2x128xf32>
      %11 = vector.shape_cast %10 : vector<1x1x2x128xf32> to vector<2x128xf32>
      %12 = arith.mulf %11, %11 : vector<2x128xf32>
      %13 = arith.addf %arg5, %12 : vector<2x128xf32>
      scf.yield %13 : vector<2x128xf32>
    }
    %c4_i32_0 = arith.constant 4 : i32
    %cst_1 = arith.constant 2.500000e-01 : f32
    %3 = vector.broadcast %cst_1 : f32 to vector<2x128xf32>
    %4 = arith.mulf %2, %3 : vector<2x128xf32>
    %cst_2 = arith.constant 9.99999993E-9 : f32
    %5 = vector.broadcast %cst_2 : f32 to vector<2x128xf32>
    %6 = arith.addf %4, %5 : vector<2x128xf32>
    %7 = math.rsqrt %6 : vector<2x128xf32>
    %c0_i32_3 = arith.constant 0 : i32
    %c4_i32_4 = arith.constant 4 : i32
    %8 = arith.addi %c0_i32_3, %c4_i32_4 : i32
    %c1_i32_5 = arith.constant 1 : i32
    scf.for %arg4 = %c0_i32_3 to %8 step %c1_i32_5  : i32 {
      %c0 = arith.constant 0 : index
      %9 = arith.index_cast %arg4 : i32 to index
      %c0_7 = arith.constant 0 : index
      %c0_8 = arith.constant 0 : index
      %10 = vector.load %arg2[%c0, %9, %c0_7, %c0_8] : memref<1x4x2x128xf32, #tpu.memory_space<vmem>>, vector<1x1x2x128xf32>
      %11 = vector.shape_cast %10 : vector<1x1x2x128xf32> to vector<2x128xf32>
      %12 = arith.mulf %11, %7 : vector<2x128xf32>
      %c0_9 = arith.constant 0 : index
      %13 = arith.index_cast %arg4 : i32 to index
      %c0_10 = arith.constant 0 : index
      %c0_11 = arith.constant 0 : index
      %14 = vector.load %arg3[%c0_9, %13, %c0_10, %c0_11] : memref<1x4x2x128xf32, #tpu.memory_space<vmem>>, vector<1x1x2x128xf32>
      %15 = vector.shape_cast %14 : vector<1x1x2x128xf32> to vector<2x128xf32>
      %16 = vector.shape_cast %12 : vector<2x128xf32> to vector<1x1x2x128xf32>
      tpu.vector_store %arg3[%c0_9, %13, %c0_10, %c0_11], %16 {strides = array<i32>} : memref<1x4x2x128xf32, #tpu.memory_space<vmem>>, vector<1x1x2x128xf32>,
    }
    %c4_i32_6 = arith.constant 4 : i32
    return
  }
  func.func @transform_0(%arg0: i32, %arg1: i32) -> (i32, i32, i32, i32) {
    %c0_i32 = arith.constant 0 : i32
    %c0_i32_0 = arith.constant 0 : i32
    %c0_i32_1 = arith.constant 0 : i32
    return %arg0, %c0_i32, %arg1, %c0_i32_0 : i32, i32, i32, i32
  }
  func.func @transform_1(%arg0: i32, %arg1: i32) -> (i32, i32, i32, i32) {
    %c0_i32 = arith.constant 0 : i32
    %c0_i32_0 = arith.constant 0 : i32
    %c0_i32_1 = arith.constant 0 : i32
    return %arg0, %c0_i32, %arg1, %c0_i32_0 : i32, i32, i32, i32
  }
}

</mosaic_0001>

<bundles_post_ra>
// kernel: tpu_custom_call.1
= control target key start
LH: loop header
LB: loop body
LE: loop exit
PB: predicated region body
PF: predicated region fallthrough
CT: control target
= control target key end

     0   :  { %6 = vsyncpa [#allocation3], 0  ;;  %s746_s0 = inlined_call_operand.hbm [shape: f32[2,4,2,128], index: 0, kind: input, shape index: {}]   ;;  %s747_s1 = inlined_call_operand.hbm [shape: f32[2,4,2,128], index: 1, kind: output, shape index: {}]  }
   0x1   :  { %8 = vsyncpa [#allocation3 + $0x1], 0 }
   0x2   :  { %9 = vsyncpa [#allocation4], 0 }
   0x3   :  { %11 = vsyncpa [#allocation4 + $0x1], 0  ;;  %s563_s6 = smov 0   ;;  %s565_s7 = smov 0  }
   0x4   :  { %s567_s8 = smov 0   ;;  %s569_s9 = smov 0  }
   0x5   :  { %s571_s10 = smov 0   ;;  %s573_s11 = smov 0  }
   0x6 LB: > { %s298_s12 = sadd.s32 4294967295, %s533_s11   ;;  %s299_s13 = sadd.s32 4294967294, %s533_s11   ;;  %s533_s11 = sphi %s573_s11, %s17_s11   ;;  %s529_s10 = sphi %s571_s10, %s762_s10   ;;  %s525_s9 = sphi %s569_s9, %s761_s9   ;;  %s521_s8 = sphi %s567_s8, %s760_s8   ;;  %s517_s7 = sphi %s565_s7, %s759_s7   ;;  %s513_s6 = sphi %s563_s6, %s758_s6  }
   0x7   : > { %s29_s14 = sadd.s32 1, %s529_s10  ;;  %s38_s15 = sadd.s32 1, %s521_s8 }
   0x8   : > { %p31_p0 = scmp.ge.s32.totalorder %s29_s14, 2  ;;  %p45_p1 = scmp.ne.s32.totalorder %s521_s8, %s517_s7 }
   0x9   : > { %p46_p2 = scmp.eq.s32.totalorder %s533_s11, 0  ;;  %p51_p3 = scmp.ne.s32.totalorder %s517_s7, %s513_s6 }
   0xa   : > { %s764_s14 = smov (%p31_p0, %s29_s14), 0  ;;  %p52_p5 = scmp.eq.s32.totalorder %s298_s12, 0 }
   0xb   : > { %p604_p4 = por %p46_p2, %p45_p1  ;;  %s33_s17 = ssub.s32 %s529_s10, %s764_s14 }
   0xc   : > { %p77_p6 = scmp.eq.s32.totalorder %s298_s12, 1  ;;  %p36_p7 = scmp.eq.s32.totalorder %s33_s17, 0 }
   0xd   : > { %p610_p8 = por %p52_p5, %p51_p3  ;;  %p83_p10 = scmp.eq.s32.totalorder %s299_s13, 1 }
   0xe   : > { %p614_p9 = por %p77_p6, %p45_p1  ;;  %p329_p13 = scmp.lt.s32.totalorder %s533_s11, 2 }
   0xf   : > { %s619_s20 = scalar_select %p36_p7, %s521_s8, %s38_s15  }
  0x10   : > { %s751_s19 = scalar_select %p614_p9, 1, 0 }
  0x11   : > { %p621_p11 = por %p83_p10, %p51_p3  ;;  %s103_s22 = sand.u32 1, %s521_s8  }
  0x12   : > { %s302_s23 = sshll.u32 %s103_s22, 3  ;;  %s315_s24 = sshll.u32 %s529_s10, 7 }
  0x13   : > { %s752_s21 = scalar_select %p621_p11, 1, 0 }
  0x14   : > { %s632_s27 = scalar_lea.hbm %s746_s0, %s315_s24  ;;  %s107_s28 = scalar_lea.vmem [#allocation2], %s302_s23 }
  0x15   : > { %s115_s29 = sshll.u32 %s107_s28, 4  ;;  %p638_p0 = pnand %p329_p13, %p604_p4  ;;  %s634_s29 = int_to_ptr.vmem [resolvable:$true] %s115_s29 }
  0x16   : > { %s643_s2 = scalar_lea.sflag [#allocation3], %s103_s22  ;;  %s409_s3 = scalar_lea.hbm %s632_s27, 128 }
  0x17   : > { %p410_p2 = scmp.ne.s32.totalorder %s632_s27, %s409_s3  ;;  %p411_p3 = pneg %p638_p0 }
  0x18   : > { %s414_s12 = scalar_lea.hbm %s746_s0, 256  ;;  %p415_p4 = scmp.lt.u32.totalorder %s632_s27, %s746_s0 }
  0x19   : > { %p412_p5 = pnand %p411_p3, %p410_p2  ;;  %p416_p7 = scmp.lt.u32.totalorder %s414_s12, %s409_s3 }
  0x1a   : > { %p418_p13 = scmp.lt.u32.totalorder %s409_s3, %s632_s27 }
  0x1b   : > { %p413_p6 = pneg %p412_p5  ;;  %p417_p10 = por %p416_p7, %p415_p4 }
  0x1d   : > { %p419_p12 = por %p418_p13, %p417_p10 }
  0x1f   : > { %p420_p1 = pnand %p419_p12, %p413_p6 }
  0x21   : > { %423 = shalt.err (!%p420_p1)
}
  0x22   : > { %s424_s16 = scalar_lea.vmem %s634_s29, 128  ;;  %s547_s17 = smov [#allocation2]  }
  0x23   : > { %p425_p2 = scmp.ne.s32.totalorder %s634_s29, %s424_s16  ;;  %s429_s22 = sshll.u32 %s547_s17, 4  ;;  %s430_s22 = int_to_ptr.vmem [resolvable:$false] %s429_s22 }
  0x24   : > { %s431_s23 = scalar_lea.vmem %s430_s22, 256  ;;  %p432_p9 = scmp.lt.s32.totalorder %s634_s29, %s430_s22 }
  0x25   : > { %p427_p5 = pnand %p425_p2, %p411_p3  ;;  %p433_p4 = scmp.lt.s32.totalorder %s431_s23, %s424_s16 }
  0x27   : > { %p428_p11 = pneg %p427_p5  ;;  %p434_p7 = por %p433_p4, %p432_p9 }
  0x29   : > { %p435_p10 = pnand %p434_p7, %p428_p11 }
  0x2b   : > { %438 = shalt.err (!%p435_p10)
}
  0x2c   : > { %s548_s24 = smov 32   ;;  %s549_s25 = smov 2  }
  0x2d   : > { %324 = dma.hbm_to_vmem [thread:$0]  (!%p638_p0), %s632_s27, 128, %s634_s29, %s643_s2, %s548_s24, %s548_s24, %s549_s25  }
  0x2e   : > { %p123_p12 = scmp.lt.s32.totalorder %s533_s11, 3  ;;  %p754_p1 = scmp.ge.s32.totalorder %s533_s11, 1 }
  0x30   : > { %p124_p3 = pnand %p754_p1, %p123_p12 }
  0x31   : > { %s675_s26 = sand.u32 (!%p124_p3), 1, %s517_s7  }
  0x32   : > { %127 = sbr.rel (%p124_p3) target bundleno = 111 (0x6f), region = 24  ;;  %s306_s28 = sshll.u32 (!%p124_p3), %s675_s26, 3 }
  0x33   : > { %s130_s3 = scalar_lea.sflag (!%p124_p3), [#allocation3], %s675_s26  ;;  %s679_s4 = scalar_lea.vmem (!%p124_p3), [#allocation2], %s306_s28 }
  0x39   : > { %504 = dma.done.wait (%p610_p8), %s130_s3, 128  }
  0x3a   : > { %506 = vsyncadd (%p610_p8), %s130_s3, 4294967168  ;;  %s685_s27 = scalar_lea.vmem [#allocation5], %s306_s28  ;;  %v535_v0 = vmov 0.0   ;;  %s539_s29 = smov 0  }
  0x3b LB: >> { %s308_s30 = sshll.u32 %s541_s29, 1  ;;  %s157_s29 = sadd.s32 1, %s541_s29   ;;  %s541_s29 = sphi %s539_s29, %s157_s29   ;;  %v537_v0 = vphi %v535_v0, %v536_v0  }
  0x3c   : >> { %s160_s2 = scalar_lea.vmem %s679_s4, %s308_s30 [#allocation2]  ;;  %p154_p9 = scmp.ge.s32.totalorder %s157_s29, 4  }
  0x3d   : >> { %v161_v1 = vld [vmem:[%s160_s2] sm:$0x3]  ;;  %s543_s18 = smov (%p154_p9), 0  }
  0x3e   : >> { %v162_v2 = vmul.f32 %v161_v1, %v161_v1  ;;  %156 = sbr.rel (!%p154_p9) target bundleno = 59 (0x3b), region = 86 }
  0x40   : >> { %v163_v3 = vadd.f32 %v537_v0, %v162_v2  }
  0x42   : >> { %v536_v0 = vmov %v163_v3   ;;  %v164_v4 = vmul.f32 (%p154_p9), 0.25, %v163_v3 }
  0x44   : > { %v165_v5 = vadd.f32 (%p154_p9), 1e-08, %v164_v4 }
  0x46   : > { %407 = vrsqrt.f32 %v165_v5 }
  0x50   : > { %v408_v6 = vpop.eup %407 }
  0x51 LB: >> { %s309_s5 = sshll.u32 %s545_s18, 1  ;;  %s172_s18 = sadd.s32 1, %s545_s18   ;;  %s545_s18 = sphi %s543_s18, %s172_s18  }
  0x52   : >> { %s174_s12 = scalar_lea.vmem %s679_s4, %s309_s5 [#allocation2]  ;;  %s177_s13 = scalar_lea.vmem %s685_s27, %s309_s5 [#allocation5] }
  0x53   : >> { %v175_v7 = vld [vmem:[%s174_s12] sm:$0x3]  ;;  %p169_p8 = scmp.ge.s32.totalorder %s172_s18, 4  }
  0x54   : >> { %v176_v8 = vmul.f32 %v408_v6, %v175_v7  ;;  %s316_s15 = sshll.u32 (%p169_p8), %s525_s9, 7  ;;  %s194_s23 = sshll.u32 (%p169_p8), %s685_s27, 4  ;;  %s697_s23 = int_to_ptr.vmem [resolvable:$true] %s194_s23 }
  0x55   : > { %171 = sbr.rel (!%p169_p8) target bundleno = 81 (0x51), region = 97  ;;  %s694_s22 = scalar_lea.hbm (%p169_p8), %s747_s1, %s316_s15 }
  0x56   : >> { %178 = vst [vmem:[%s177_s13] sm:$0x3] %v176_v8  ;;  %s180_s24 = scalar_lea.sflag (%p169_p8), [#allocation4], %s675_s26  ;;  %s439_s25 = scalar_lea.vmem (%p169_p8), %s697_s23, 128 }
  0x57   : > { %p440_p11 = scmp.ne.s32.totalorder (%p169_p8), %s697_s23, %s439_s25  ;;  %p755_p0 = scmp.ne.s32.totalorder (%p169_p8), %s751_s19, 0 }
  0x58   : > { %s550_s28 = smov (%p169_p8), [#allocation5]  }
  0x59   : > { %p441_p6 = pnand (%p169_p8), %p440_p11, %p755_p0  ;;  %s443_s3 = sshll.u32 (%p169_p8), %s550_s28, 4  ;;  %s444_s3 = int_to_ptr.vmem [resolvable:$false] %s443_s3 }
  0x5a   : > { %s445_s9 = scalar_lea.vmem (%p169_p8), %s444_s3, 256  ;;  %p446_p2 = scmp.lt.s32.totalorder (%p169_p8), %s697_s23, %s444_s3 }
  0x5b   : > { %p442_p13 = pneg (%p169_p8), %p441_p6  ;;  %p447_p5 = scmp.lt.s32.totalorder (%p169_p8), %s445_s9, %s439_s25 }
  0x5d   : > { %p448_p4 = por %p447_p5, %p446_p2 }
  0x5f   : > { %p449_p7 = pnand %p448_p4, %p442_p13 }
  0x61   : > { %452 = shalt.err (!%p449_p7)
}
  0x62   : > { %s453_s4 = scalar_lea.hbm %s694_s22, 128  ;;  %s457_s30 = scalar_lea.hbm %s747_s1, 256 }
  0x63   : > { %p454_p10 = scmp.ne.s32.totalorder %s694_s22, %s453_s4  ;;  %p458_p3 = scmp.lt.u32.totalorder %s694_s22, %s747_s1 }
  0x64   : > { %p459_p9 = scmp.lt.u32.totalorder %s457_s30, %s453_s4  ;;  %p461_p11 = scmp.lt.u32.totalorder %s453_s4, %s694_s22 }
  0x65   : > { %p455_p12 = pnand %p454_p10, %p755_p0 }
  0x66   : > { %p460_p8 = por %p459_p9, %p458_p3 }
  0x67   : > { %p456_p1 = pneg %p455_p12 }
  0x68   : > { %p462_p6 = por %p461_p11, %p460_p8 }
  0x6a   : > { %p463_p13 = pnand %p462_p6, %p456_p1 }
  0x6c   : > { %466 = shalt.err (!%p463_p13)
}
  0x6d   : > { %s551_s5 = smov 32   ;;  %s552_s12 = smov 2  }
  0x6e   : > { %319 = dma.vmem_to_hbm [thread:$0]  (%p755_p0), %s697_s23, 128, %s694_s22, %s180_s24, %s551_s5, %s551_s5, %s552_s12  }
  0x6f PF: > { %s209_s13 = sand.u32 1, %s513_s6   ;;  %p756_p2 = scmp.ne.s32.totalorder %s752_s21, 0 }
  0x70   : > { %p757_p5 = scmp.ge.s32.totalorder %s533_s11, 2  ;;  %s210_s15 = scalar_lea.sflag [#allocation4], %s209_s13 }
  0x72   : > { %p326_p4 = pnand %p757_p5, %p756_p2 }
  0x74   : > { %508 = dma.done.wait (!%p326_p4), %s210_s15, 128  }
  0x75   : > { %510 = vsyncadd (!%p326_p4), %s210_s15, 4294967168  ;;  %s17_s11 = sadd.s32 1, %s533_s11   ;;  %s758_s6 = smov %s517_s7 }
  0x76   : > { %p14_p7 = scmp.ge.s32.totalorder %s17_s11, 4   ;;  %s759_s7 = smov %s521_s8 }
  0x77   : > { %s760_s8 = smov %s619_s20  ;;  %s761_s9 = smov %s529_s10 }
  0x78   : > { %s762_s10 = smov %s764_s14  ;;  %16 = sbr.rel (!%p14_p7) target bundleno = 6 (0x6), region = 108 }
  0x7f   :  { %215 = vsyncpa [#allocation3], 1 }
  0x80   :  { %217 = vsyncpa [#allocation3 + $0x1], 1 }
  0x81   :  { %218 = vsyncpa [#allocation4], 1 }
  0x82   :  { %220 = vsyncpa [#allocation4 + $0x1], 1 }

</bundles_post_ra>
